<compile_context>
chip_gen: v7x
topology: tpu7x:2x2x1
jax: 0.10.0
libtpu: 0.0.40
codegen_flags: <defaults>
</compile_context>

<pallas_src>
import functools

import jax
import jax.numpy as jnp
from jax.experimental import pallas as pl
from jax.experimental.pallas import tpu as pltpu

HIDDEN = 20
N_HIDDEN_LAYERS = 6  # the six Linear(20,20) layers between the first and last


def _silu(x):
    return x * jax.nn.sigmoid(x)


def mlp_kernel(t_ref, w_in_ref, b_in_ref, w_hid_ref, b_hid_ref,
               w_out_ref, b_out_ref, o_ref):
    # t tile: (1, BM), batch along lanes.
    t = t_ref[...]

    # First layer (fan_in = 1): a K=1 matmul is pure MXU push/pop overhead, so
    # do it as a broadcast multiply-add on the VPU instead:
    #   (20, 1) * (1, BM) + (20, 1) -> (20, BM)
    h = _silu(w_in_ref[...] * t + b_in_ref[...])

    # Six hidden Linear(20,20) + SiLU layers, statically unrolled so the
    # scheduler can overlap MXU pushes, bias adds, and EUP sigmoid work across
    # layers.  Weights are (out, in); activations are (features, batch).
    for layer in range(N_HIDDEN_LAYERS):
        w = w_hid_ref[layer]          # (20, 20)
        b = b_hid_ref[layer]          # (20, 1), broadcast along lanes
        h = _silu(jnp.dot(w, h, preferred_element_type=jnp.float32) + b)

    # Output layer: (1, 20) @ (20, BM) + (1, 1) -> lane-dense (1, BM) slab.
    out = jnp.dot(w_out_ref[...], h,
                  preferred_element_type=jnp.float32) + b_out_ref[...]
    o_ref[...] = out.astype(o_ref.dtype)


def _round_up(x, m):
    return ((x + m - 1) // m) * m


@functools.partial(jax.jit, static_argnames=("block_m",))
def spring_forward(t, params, *, block_m=1024):
    """Evaluate the SpringEquationNN MLP on t of shape (N, 1)."""
    w_in, b_in, w_hid, b_hid, w_out, b_out = params
    n = t.shape[0]

    # Pick the row tile.  Batch lives on the lane axis, so BM must be a
    # multiple of 128.  Keep >= 2 grid steps when the batch allows it so the
    # "parallel" axis can be sharded across v7x's two TensorCores.
    bm = _round_up(min(block_m, max(n, 1)), 128)
    if n > 128 and n <= bm:
        bm = max(128, _round_up((n + 1) // 2, 128))
    padded_n = bm * ((n + bm - 1) // bm)

    # (N, 1) -> (1, N) in the wrapper; zero-pad the tail tile (SiLU(0) is
    # finite, padded columns are sliced off below).
    t_row = t.reshape(1, n)
    if padded_n != n:
        t_row = jnp.pad(t_row, ((0, 0), (0, padded_n - n)))

    grid = (padded_n // bm,)

    # Weights/biases: full-array blocks with constant index maps -> resident in
    # VMEM, no per-step re-DMA (total ~10 KB).
    def full(shape):
        return pl.BlockSpec(shape, lambda i: (0,) * len(shape))

    out_row = pl.pallas_call(
        mlp_kernel,
        out_shape=jax.ShapeDtypeStruct((1, padded_n), t.dtype),
        grid_spec=pltpu.PrefetchScalarGridSpec(
            num_scalar_prefetch=0,
            grid=grid,
            in_specs=[
                pl.BlockSpec((1, bm), lambda i: (0, i)),   # t tile, lane-dense
                full(w_in.shape),                          # (20, 1)
                full(b_in.shape),                          # (20, 1)
                full(w_hid.shape),                         # (6, 20, 20)
                full(b_hid.shape),                         # (6, 20, 1)
                full(w_out.shape),                         # (1, 20)
                full(b_out.shape),                         # (1, 1)
            ],
            out_specs=pl.BlockSpec((1, bm), lambda i: (0, i)),
        ),
        compiler_params=pltpu.CompilerParams(
            dimension_semantics=("parallel",)),
    )(t_row, w_in, b_in, w_hid, b_hid, w_out, b_out)

    return out_row[0, :n].reshape(n, 1)


def init_params(key):
    """Deterministic init mimicking torch.nn.Linear defaults
    (U(-1/sqrt(fan_in), 1/sqrt(fan_in)) for weight and bias).
    Weights are stored (out, in); biases as (out, 1)."""
    keys = jax.random.split(key, 16)

    def linear(kw, kb, fan_in, fan_out):
        bound = 1.0 / jnp.sqrt(float(fan_in))
        w = jax.random.uniform(kw, (fan_out, fan_in), jnp.float32, -bound, bound)
        b = jax.random.uniform(kb, (fan_out, 1), jnp.float32, -bound, bound)
        return w, b

    w_in, b_in = linear(keys[0], keys[1], 1, HIDDEN)

    w_hid_list, b_hid_list = [], []
    for layer in range(N_HIDDEN_LAYERS):
        w, b = linear(keys[2 + 2 * layer], keys[3 + 2 * layer], HIDDEN, HIDDEN)
        w_hid_list.append(w)
        b_hid_list.append(b)
    w_hid = jnp.stack(w_hid_list, axis=0)            # (6, 20, 20)  (out, in)
    b_hid = jnp.stack(b_hid_list, axis=0)            # (6, 20, 1)

    w_out, b_out = linear(keys[14], keys[15], HIDDEN, 1)   # (1, 20), (1, 1)
    return (w_in, b_in, w_hid, b_hid, w_out, b_out)


def reference_forward(t, params):
    """Pure-JAX reference in the usual (batch, feature) orientation."""
    w_in, b_in, w_hid, b_hid, w_out, b_out = params
    h = jax.nn.silu(t @ w_in.T + b_in.T)
    for layer in range(N_HIDDEN_LAYERS):
        h = jax.nn.silu(h @ w_hid[layer].T + b_hid[layer].T)
    return h @ w_out.T + b_out.T


# TODO(synk): the physics loss (torch.autograd.grad w.r.t. t, k/mu terms, Adam)
# is training-time machinery, not part of forward(); not implemented here.

if __name__ == "__main__":
    key = jax.random.PRNGKey(0)
    pkey, tkey = jax.random.split(key)

    params = init_params(pkey)

    # Batch of time points, shape (N, 1), like the torch input t.
    n = 256
    t = jax.random.uniform(tkey, (n, 1), jnp.float32, 0.0, 1.0)

    out = spring_forward(t, params)
    out = jax.block_until_ready(out)

    ref = reference_forward(t, params)
    assert out.shape == (n, 1)
    assert jnp.allclose(out, ref, atol=1e-5, rtol=1e-4), (
        float(jnp.max(jnp.abs(out - ref))))

    print("KERNEL_OK")
</pallas_src>

<mosaic_0001>
module attributes {stable_mosaic.version = 11 : i64} {
  func.func @mlp_kernel(%arg0: i32, %arg1: memref<1x128xf32, #tpu.memory_space<vmem>>, %arg2: memref<20x1xf32, #tpu.memory_space<vmem>>, %arg3: memref<20x1xf32, #tpu.memory_space<vmem>>, %arg4: memref<6x20x20xf32, #tpu.memory_space<vmem>>, %arg5: memref<6x20x1xf32, #tpu.memory_space<vmem>>, %arg6: memref<1x20xf32, #tpu.memory_space<vmem>>, %arg7: memref<1x1xf32, #tpu.memory_space<vmem>>, %arg8: memref<1x128xf32, #tpu.memory_space<vmem>>) attributes {dimension_semantics = [#tpu.dimension_semantics<parallel>], iteration_bounds = array<i64: 2>, scalar_prefetch = 0 : i64, scratch_operands = 0 : i64, tpu.core_type = #tpu.core_type<tc>, window_params = [{transform_indices = @transform_0, window_bounds = array<i64: 1, 128>}, {pipeline_mode = #tpu.pipeline_mode<synchronous>, transform_indices = @transform_1, window_bounds = array<i64: 20, 1>}, {pipeline_mode = #tpu.pipeline_mode<synchronous>, transform_indices = @transform_2, window_bounds = array<i64: 20, 1>}, {pipeline_mode = #tpu.pipeline_mode<synchronous>, transform_indices = @transform_3, window_bounds = array<i64: 6, 20, 20>}, {pipeline_mode = #tpu.pipeline_mode<synchronous>, transform_indices = @transform_4, window_bounds = array<i64: 6, 20, 1>}, {pipeline_mode = #tpu.pipeline_mode<synchronous>, transform_indices = @transform_5, window_bounds = array<i64: 1, 20>}, {pipeline_mode = #tpu.pipeline_mode<synchronous>, transform_indices = @transform_6, window_bounds = array<i64: 1, 1>}, {transform_indices = @transform_7, window_bounds = array<i64: 1, 128>}]} {
    %c0 = arith.constant 0 : index
    %c0_0 = arith.constant 0 : index
    %0 = vector.load %arg1[%c0, %c0_0] : memref<1x128xf32, #tpu.memory_space<vmem>>, vector<1x128xf32>
    %c0_1 = arith.constant 0 : index
    %c0_2 = arith.constant 0 : index
    %1 = vector.load %arg2[%c0_1, %c0_2] : memref<20x1xf32, #tpu.memory_space<vmem>>, vector<20x1xf32>
    %2 = vector.broadcast %1 : vector<20x1xf32> to vector<20x128xf32>
    %3 = vector.broadcast %0 : vector<1x128xf32> to vector<20x128xf32>
    %4 = arith.mulf %2, %3 : vector<20x128xf32>
    %c0_3 = arith.constant 0 : index
    %c0_4 = arith.constant 0 : index
    %5 = vector.load %arg3[%c0_3, %c0_4] : memref<20x1xf32, #tpu.memory_space<vmem>>, vector<20x1xf32>
    %6 = vector.broadcast %5 : vector<20x1xf32> to vector<20x128xf32>
    %7 = arith.addf %4, %6 : vector<20x128xf32>
    %8 = arith.negf %7 : vector<20x128xf32>
    %9 = math.exp %8 : vector<20x128xf32>
    %cst = arith.constant 1.000000e+00 : f32
    %10 = vector.broadcast %cst : f32 to vector<20x128xf32>
    %11 = arith.addf %10, %9 : vector<20x128xf32>
    %12 = arith.divf %10, %11 : vector<20x128xf32>
    %13 = arith.mulf %7, %12 : vector<20x128xf32>
    %c0_5 = arith.constant 0 : index
    %c0_6 = arith.constant 0 : index
    %c0_7 = arith.constant 0 : index
    %14 = vector.load %arg4[%c0_5, %c0_6, %c0_7] : memref<6x20x20xf32, #tpu.memory_space<vmem>>, vector<1x20x20xf32>
    %15 = vector.shape_cast %14 : vector<1x20x20xf32> to vector<20x20xf32>
    %c0_8 = arith.constant 0 : index
    %c0_9 = arith.constant 0 : index
    %c0_10 = arith.constant 0 : index
    %16 = vector.load %arg5[%c0_8, %c0_9, %c0_10] : memref<6x20x1xf32, #tpu.memory_space<vmem>>, vector<1x20x1xf32>
    %17 = vector.shape_cast %16 : vector<1x20x1xf32> to vector<20x1xf32>
    %cst_11 = arith.constant dense<0.000000e+00> : vector<20x128xf32>
    %18 = tpu.matmul %15, %13, %cst_11 {dimension_numbers = #tpu.dot_dimension_numbers<[1], [0], [0], [1], [0, 0, 1, 1], [], []>} : vector<20x20xf32>, vector<20x128xf32>, vector<20x128xf32> -> vector<20x128xf32>
    %19 = vector.broadcast %17 : vector<20x1xf32> to vector<20x128xf32>
    %20 = arith.addf %18, %19 : vector<20x128xf32>
    %21 = arith.negf %20 : vector<20x128xf32>
    %22 = math.exp %21 : vector<20x128xf32>
    %cst_12 = arith.constant 1.000000e+00 : f32
    %23 = vector.broadcast %cst_12 : f32 to vector<20x128xf32>
    %24 = arith.addf %23, %22 : vector<20x128xf32>
    %25 = arith.divf %23, %24 : vector<20x128xf32>
    %26 = arith.mulf %20, %25 : vector<20x128xf32>
    %c1 = arith.constant 1 : index
    %c0_13 = arith.constant 0 : index
    %c0_14 = arith.constant 0 : index
    %27 = vector.load %arg4[%c1, %c0_13, %c0_14] : memref<6x20x20xf32, #tpu.memory_space<vmem>>, vector<1x20x20xf32>
    %28 = vector.shape_cast %27 : vector<1x20x20xf32> to vector<20x20xf32>
    %c1_15 = arith.constant 1 : index
    %c0_16 = arith.constant 0 : index
    %c0_17 = arith.constant 0 : index
    %29 = vector.load %arg5[%c1_15, %c0_16, %c0_17] : memref<6x20x1xf32, #tpu.memory_space<vmem>>, vector<1x20x1xf32>
    %30 = vector.shape_cast %29 : vector<1x20x1xf32> to vector<20x1xf32>
    %cst_18 = arith.constant dense<0.000000e+00> : vector<20x128xf32>
    %31 = tpu.matmul %28, %26, %cst_18 {dimension_numbers = #tpu.dot_dimension_numbers<[1], [0], [0], [1], [0, 0, 1, 1], [], []>} : vector<20x20xf32>, vector<20x128xf32>, vector<20x128xf32> -> vector<20x128xf32>
    %32 = vector.broadcast %30 : vector<20x1xf32> to vector<20x128xf32>
    %33 = arith.addf %31, %32 : vector<20x128xf32>
    %34 = arith.negf %33 : vector<20x128xf32>
    %35 = math.exp %34 : vector<20x128xf32>
    %cst_19 = arith.constant 1.000000e+00 : f32
    %36 = vector.broadcast %cst_19 : f32 to vector<20x128xf32>
    %37 = arith.addf %36, %35 : vector<20x128xf32>
    %38 = arith.divf %36, %37 : vector<20x128xf32>
    %39 = arith.mulf %33, %38 : vector<20x128xf32>
    %c2 = arith.constant 2 : index
    %c0_20 = arith.constant 0 : index
    %c0_21 = arith.constant 0 : index
    %40 = vector.load %arg4[%c2, %c0_20, %c0_21] : memref<6x20x20xf32, #tpu.memory_space<vmem>>, vector<1x20x20xf32>
    %41 = vector.shape_cast %40 : vector<1x20x20xf32> to vector<20x20xf32>
    %c2_22 = arith.constant 2 : index
    %c0_23 = arith.constant 0 : index
    %c0_24 = arith.constant 0 : index
    %42 = vector.load %arg5[%c2_22, %c0_23, %c0_24] : memref<6x20x1xf32, #tpu.memory_space<vmem>>, vector<1x20x1xf32>
    %43 = vector.shape_cast %42 : vector<1x20x1xf32> to vector<20x1xf32>
    %cst_25 = arith.constant dense<0.000000e+00> : vector<20x128xf32>
    %44 = tpu.matmul %41, %39, %cst_25 {dimension_numbers = #tpu.dot_dimension_numbers<[1], [0], [0], [1], [0, 0, 1, 1], [], []>} : vector<20x20xf32>, vector<20x128xf32>, vector<20x128xf32> -> vector<20x128xf32>
    %45 = vector.broadcast %43 : vector<20x1xf32> to vector<20x128xf32>
    %46 = arith.addf %44, %45 : vector<20x128xf32>
    %47 = arith.negf %46 : vector<20x128xf32>
    %48 = math.exp %47 : vector<20x128xf32>
    %cst_26 = arith.constant 1.000000e+00 : f32
    %49 = vector.broadcast %cst_26 : f32 to vector<20x128xf32>
    %50 = arith.addf %49, %48 : vector<20x128xf32>
    %51 = arith.divf %49, %50 : vector<20x128xf32>
    %52 = arith.mulf %46, %51 : vector<20x128xf32>
    %c3 = arith.constant 3 : index
    %c0_27 = arith.constant 0 : index
    %c0_28 = arith.constant 0 : index
    %53 = vector.load %arg4[%c3, %c0_27, %c0_28] : memref<6x20x20xf32, #tpu.memory_space<vmem>>, vector<1x20x20xf32>
    %54 = vector.shape_cast %53 : vector<1x20x20xf32> to vector<20x20xf32>
    %c3_29 = arith.constant 3 : index
    %c0_30 = arith.constant 0 : index
    %c0_31 = arith.constant 0 : index
    %55 = vector.load %arg5[%c3_29, %c0_30, %c0_31] : memref<6x20x1xf32, #tpu.memory_space<vmem>>, vector<1x20x1xf32>
    %56 = vector.shape_cast %55 : vector<1x20x1xf32> to vector<20x1xf32>
    %cst_32 = arith.constant dense<0.000000e+00> : vector<20x128xf32>
    %57 = tpu.matmul %54, %52, %cst_32 {dimension_numbers = #tpu.dot_dimension_numbers<[1], [0], [0], [1], [0, 0, 1, 1], [], []>} : vector<20x20xf32>, vector<20x128xf32>, vector<20x128xf32> -> vector<20x128xf32>
    %58 = vector.broadcast %56 : vector<20x1xf32> to vector<20x128xf32>
    %59 = arith.addf %57, %58 : vector<20x128xf32>
    %60 = arith.negf %59 : vector<20x128xf32>
    %61 = math.exp %60 : vector<20x128xf32>
    %cst_33 = arith.constant 1.000000e+00 : f32
    %62 = vector.broadcast %cst_33 : f32 to vector<20x128xf32>
    %63 = arith.addf %62, %61 : vector<20x128xf32>
    %64 = arith.divf %62, %63 : vector<20x128xf32>
    %65 = arith.mulf %59, %64 : vector<20x128xf32>
    %c4 = arith.constant 4 : index
    %c0_34 = arith.constant 0 : index
    %c0_35 = arith.constant 0 : index
    %66 = vector.load %arg4[%c4, %c0_34, %c0_35] : memref<6x20x20xf32, #tpu.memory_space<vmem>>, vector<1x20x20xf32>
    %67 = vector.shape_cast %66 : vector<1x20x20xf32> to vector<20x20xf32>
    %c4_36 = arith.constant 4 : index
    %c0_37 = arith.constant 0 : index
    %c0_38 = arith.constant 0 : index
    %68 = vector.load %arg5[%c4_36, %c0_37, %c0_38] : memref<6x20x1xf32, #tpu.memory_space<vmem>>, vector<1x20x1xf32>
    %69 = vector.shape_cast %68 : vector<1x20x1xf32> to vector<20x1xf32>
    %cst_39 = arith.constant dense<0.000000e+00> : vector<20x128xf32>
    %70 = tpu.matmul %67, %65, %cst_39 {dimension_numbers = #tpu.dot_dimension_numbers<[1], [0], [0], [1], [0, 0, 1, 1], [], []>} : vector<20x20xf32>, vector<20x128xf32>, vector<20x128xf32> -> vector<20x128xf32>
    %71 = vector.broadcast %69 : vector<20x1xf32> to vector<20x128xf32>
    %72 = arith.addf %70, %71 : vector<20x128xf32>
    %73 = arith.negf %72 : vector<20x128xf32>
    %74 = math.exp %73 : vector<20x128xf32>
    %cst_40 = arith.constant 1.000000e+00 : f32
    %75 = vector.broadcast %cst_40 : f32 to vector<20x128xf32>
    %76 = arith.addf %75, %74 : vector<20x128xf32>
    %77 = arith.divf %75, %76 : vector<20x128xf32>
    %78 = arith.mulf %72, %77 : vector<20x128xf32>
    %c5 = arith.constant 5 : index
    %c0_41 = arith.constant 0 : index
    %c0_42 = arith.constant 0 : index
    %79 = vector.load %arg4[%c5, %c0_41, %c0_42] : memref<6x20x20xf32, #tpu.memory_space<vmem>>, vector<1x20x20xf32>
    %80 = vector.shape_cast %79 : vector<1x20x20xf32> to vector<20x20xf32>
    %c5_43 = arith.constant 5 : index
    %c0_44 = arith.constant 0 : index
    %c0_45 = arith.constant 0 : index
    %81 = vector.load %arg5[%c5_43, %c0_44, %c0_45] : memref<6x20x1xf32, #tpu.memory_space<vmem>>, vector<1x20x1xf32>
    %82 = vector.shape_cast %81 : vector<1x20x1xf32> to vector<20x1xf32>
    %cst_46 = arith.constant dense<0.000000e+00> : vector<20x128xf32>
    %83 = tpu.matmul %80, %78, %cst_46 {dimension_numbers = #tpu.dot_dimension_numbers<[1], [0], [0], [1], [0, 0, 1, 1], [], []>} : vector<20x20xf32>, vector<20x128xf32>, vector<20x128xf32> -> vector<20x128xf32>
    %84 = vector.broadcast %82 : vector<20x1xf32> to vector<20x128xf32>
    %85 = arith.addf %83, %84 : vector<20x128xf32>
    %86 = arith.negf %85 : vector<20x128xf32>
    %87 = math.exp %86 : vector<20x128xf32>
    %cst_47 = arith.constant 1.000000e+00 : f32
    %88 = vector.broadcast %cst_47 : f32 to vector<20x128xf32>
    %89 = arith.addf %88, %87 : vector<20x128xf32>
    %90 = arith.divf %88, %89 : vector<20x128xf32>
    %91 = arith.mulf %85, %90 : vector<20x128xf32>
    %c0_48 = arith.constant 0 : index
    %c0_49 = arith.constant 0 : index
    %92 = vector.load %arg6[%c0_48, %c0_49] : memref<1x20xf32, #tpu.memory_space<vmem>>, vector<1x20xf32>
    %cst_50 = arith.constant dense<0.000000e+00> : vector<1x128xf32>
    %93 = tpu.matmul %92, %91, %cst_50 {dimension_numbers = #tpu.dot_dimension_numbers<[1], [0], [0], [1], [0, 0, 1, 1], [], []>} : vector<1x20xf32>, vector<20x128xf32>, vector<1x128xf32> -> vector<1x128xf32>
    %c0_51 = arith.constant 0 : index
    %c0_52 = arith.constant 0 : index
    %94 = vector.load %arg7[%c0_51, %c0_52] : memref<1x1xf32, #tpu.memory_space<vmem>>, vector<1x1xf32>
    %95 = vector.broadcast %94 : vector<1x1xf32> to vector<1x128xf32>
    %96 = arith.addf %93, %95 : vector<1x128xf32>
    %c0_53 = arith.constant 0 : index
    %c0_54 = arith.constant 0 : index
    %97 = vector.load %arg8[%c0_53, %c0_54] : memref<1x128xf32, #tpu.memory_space<vmem>>, vector<1x128xf32>
    tpu.vector_store %arg8[%c0_53, %c0_54], %96 {strides = array<i32>} : memref<1x128xf32, #tpu.memory_space<vmem>>, vector<1x128xf32>,
    return
  }
  func.func @transform_0(%arg0: i32) -> (i32, i32) {
    %c0_i32 = arith.constant 0 : i32
    %c0_i32_0 = arith.constant 0 : i32
    return %c0_i32, %arg0 : i32, i32
  }
  func.func @transform_1(%arg0: i32) -> (i32, i32) {
    %c0_i32 = arith.constant 0 : i32
    %c0_i32_0 = arith.constant 0 : i32
    %c0_i32_1 = arith.constant 0 : i32
    return %c0_i32, %c0_i32_0 : i32, i32
  }
  func.func @transform_2(%arg0: i32) -> (i32, i32) {
    %c0_i32 = arith.constant 0 : i32
    %c0_i32_0 = arith.constant 0 : i32
    %c0_i32_1 = arith.constant 0 : i32
    return %c0_i32, %c0_i32_0 : i32, i32
  }
  func.func @transform_3(%arg0: i32) -> (i32, i32, i32) {
    %c0_i32 = arith.constant 0 : i32
    %c0_i32_0 = arith.constant 0 : i32
    %c0_i32_1 = arith.constant 0 : i32
    %c0_i32_2 = arith.constant 0 : i32
    return %c0_i32, %c0_i32_0, %c0_i32_1 : i32, i32, i32
  }
  func.func @transform_4(%arg0: i32) -> (i32, i32, i32) {
    %c0_i32 = arith.constant 0 : i32
    %c0_i32_0 = arith.constant 0 : i32
    %c0_i32_1 = arith.constant 0 : i32
    %c0_i32_2 = arith.constant 0 : i32
    return %c0_i32, %c0_i32_0, %c0_i32_1 : i32, i32, i32
  }
  func.func @transform_5(%arg0: i32) -> (i32, i32) {
    %c0_i32 = arith.constant 0 : i32
    %c0_i32_0 = arith.constant 0 : i32
    %c0_i32_1 = arith.constant 0 : i32
    return %c0_i32, %c0_i32_0 : i32, i32
  }
  func.func @transform_6(%arg0: i32) -> (i32, i32) {
    %c0_i32 = arith.constant 0 : i32
    %c0_i32_0 = arith.constant 0 : i32
    %c0_i32_1 = arith.constant 0 : i32
    return %c0_i32, %c0_i32_0 : i32, i32
  }
  func.func @transform_7(%arg0: i32) -> (i32, i32) {
    %c0_i32 = arith.constant 0 : i32
    %c0_i32_0 = arith.constant 0 : i32
    return %c0_i32, %arg0 : i32, i32
  }
}

</mosaic_0001>

<bundles_post_ra>
// kernel: spring_forward.1
= control target key start
LH: loop header
LB: loop body
LE: loop exit
PB: predicated region body
PF: predicated region fallthrough
CT: control target
= control target key end

     0   :  { %s2104_s0 = inlined_call_operand.vmem [shape: f32[1,256], index: 0, kind: input, shape index: {}]   ;;  %s2105_s1 = inlined_call_operand.vmem [shape: f32[20,1], index: 1, kind: input, shape index: {}]   ;;  %s2106_s2 = inlined_call_operand.vmem [shape: f32[20,1], index: 2, kind: input, shape index: {}]   ;;  %s2107_s3 = inlined_call_operand.vmem [shape: f32[6,20,20], index: 3, kind: input, shape index: {}]   ;;  %s2108_s4 = inlined_call_operand.vmem [shape: f32[6,20,1], index: 4, kind: input, shape index: {}]   ;;  %s2109_s5 = inlined_call_operand.vmem [shape: f32[1,20], index: 5, kind: input, shape index: {}]   ;;  %s2110_s6 = inlined_call_operand.<no memory space> [shape: f32[1,1], index: 6, kind: input, shape index: {}]   ;;  %s2111_s7 = inlined_call_operand.hbm [shape: f32[1,256], index: 7, kind: output, shape index: {}]  }
   0x1   :  { %v12_v0 = vstv %s2110_s6 }
   0x2   :  { %13 = vst [vmem:[#allocation2] sm:$0x1] %v12_v0 }
   0x3   :  { %14 = vsyncpa [#allocation4], 0 }
   0x4   :  { %16 = vsyncpa [#allocation4 + $0x1], 0  ;;  %s1797_s26 = smov 0   ;;  %s1799_s27 = smov 0  }
   0x5   :  { %s1801_s28 = smov 0   ;;  %s1803_s29 = smov 0  }
   0x6 LB: > { %s1818_s6 = sadd.s32 4294967295, %s1747_s29   ;;  %s1311_s30 = sadd.s32 4294967294, %s1747_s29   ;;  %s1747_s29 = sphi %s1803_s29, %s2117_s29   ;;  %s1743_s28 = sphi %s1801_s28, %s2116_s28   ;;  %s1739_s27 = sphi %s1799_s27, %s2115_s27   ;;  %s1735_s26 = sphi %s1797_s26, %s2114_s26  }
   0x7   : > { %s1822_s8 = sadd.s32 1, %s1747_s29   ;;  %s181_s9 = sadd.s32 1, %s1743_s28 }
   0x8   : > { %s178_s10 = ssub.s32 %s1747_s29, %s1822_s8  ;;  %p191_p0 = scmp.ne.s32.totalorder %s1743_s28, %s1739_s27 }
   0x9   : > { %p179_p1 = scmp.eq.s32.totalorder %s178_s10, 0  ;;  %p192_p2 = scmp.eq.s32.totalorder %s1818_s6, 1 }
   0xa   : > { %p197_p3 = scmp.ne.s32.totalorder %s1739_s27, %s1735_s26  ;;  %p198_p4 = scmp.eq.s32.totalorder %s1311_s30, 1 }
   0xb   : > { %s1833_s11 = scalar_select %p179_p1, %s1743_s28, %s181_s9  }
   0xc   : > { %p1835_p5 = por %p192_p2, %p191_p0  ;;  %p1839_p6 = por %p198_p4, %p197_p3 }
   0xd   : > { %p1314_p7 = scmp.ge.s32.totalorder %s1747_s29, 1  ;;  %p240_p8 = scmp.lt.s32.totalorder %s1747_s29, 3 }
   0xf   : > { %p241_p9 = pnand %p1314_p7, %p240_p8 }
  0x10   : > { %v300_v1 = vld [vmem:[%s2106_s2] sm:$0xff] (!%p241_p9)  ;;  %v1749_v3 = vmov (!%p241_p9), 0   ;;  %v301_v4 = vld [vmem:[%s2106_s2 + $0x8] sm:$0xff] (!%p241_p9)  ;;  %v302_v6 = vld [vmem:[%s2106_s2 + $0x10] sm:$0xf] (!%p241_p9)  ;;  %v1750_v24 = vmov (!%p241_p9), 0.0|0.0  }
  0x11   : > { %244 = sbr.rel (%p241_p9) target bundleno = 1935 (0x78f), region = 48  ;;  %v273_v2 = vld [vmem:[%s2105_s1] sm:$0xff] (!%p241_p9)  ;;  %1600 = vset.pattern.permute.xlu1 (!%p241_p9), %v1749_v3  ;;  %1599 = vset.pattern.permute.xlu0 (!%p241_p9), %v1749_v3  ;;  %v274_v5 = vld [vmem:[%s2105_s1 + $0x8] sm:$0xff] (!%p241_p9)  ;;  %v275_v7 = vld [vmem:[%s2105_s1 + $0x10] sm:$0xf] (!%p241_p9)  ;;  %vm1751_vm0 = vmmov (!%p241_p9), 0  }
  0x12   : > { %305 = vperm.xlu1 (!%p241_p9), %1600, %v300_v1   ;;  %278 = vperm.xlu0 (!%p241_p9), %1599, %v273_v2   ;;  %v346_v8 = vld [vmem:[%s2108_s4 + $0x8] sm:$0xff] (!%p241_p9)  ;;  %v345_v9 = vld [vmem:[%s2108_s4] sm:$0xff] (!%p241_p9)  ;;  %v1329_v10 = vld [vmem:[%s2108_s4 + $0x18] sm:$0xff] (!%p241_p9)  ;;  %v1752_v27 = vmov (!%p241_p9), 0.0   ;;  %p269_p10 = scmp.lt.s32.totalorder (!%p241_p9), %s1818_s6, 1  ;;  %vm373_vm1 = vcmask (!%p241_p9), 1043456  }
  0x13   : > { %v347_v11 = vld [vmem:[%s2108_s4 + $0x10] sm:$0xf] (!%p241_p9)  ;;  %v1331_v12 = vld [vmem:[%s2108_s4 + $0x28] sm:$0xf] (!%p241_p9)  ;;  %v1330_v13 = vld [vmem:[%s2108_s4 + $0x20] sm:$0xff] (!%p241_p9)  ;;  %1535 = vmatprep.subr.bf16.mxu0 (!%p241_p9), %v1750_v24  ;;  %1538 = vmatprep.subr.bf16.mxu1 (!%p241_p9), %v1750_v24  ;;  %vm363_vm2 = vcmask (!%p241_p9), 162816  }
  0x14   : > { %v1343_v14 = vld [vmem:[%s2108_s4 + $0x38] sm:$0xff] (!%p241_p9)  ;;  %v1342_v15 = vld [vmem:[%s2108_s4 + $0x30] sm:$0xff] (!%p241_p9)  ;;  %v1355_v16 = vld [vmem:[%s2108_s4 + $0x48] sm:$0xff] (!%p241_p9)  ;;  %1442 = vmatprep.mubr.msk.f32.mxu0 (!%p241_p9), %vm1751_vm0, %v1752_v27  ;;  %1457 = vmatprep.mubr.msk.f32.mxu1 (!%p241_p9), %vm1751_vm0, %v1752_v27  ;;  %s267_s14 = sand.u32 (!%p241_p9), 1, %s1739_s27   ;;  %s1393_s15 = sshll.u32 (!%p241_p9), %s1818_s6, 4 }
  0x15   : > { %v1344_v17 = vld [vmem:[%s2108_s4 + $0x40] sm:$0xf] (!%p241_p9)  ;;  %v1357_v18 = vld [vmem:[%s2108_s4 + $0x58] sm:$0xf] (!%p241_p9)  ;;  %v1356_v19 = vld [vmem:[%s2108_s4 + $0x50] sm:$0xff] (!%p241_p9)  ;;  %s268_s16 = scalar_lea.vmem (!%p241_p9), [#allocation3], %s267_s14 }
  0x16   : > { %310 = vperm.xlu1 (!%p241_p9), %1600, %v301_v4   ;;  %283 = vperm.xlu0 (!%p241_p9), %1599, %v274_v5   ;;  %v1369_v20 = vld [vmem:[%s2108_s4 + $0x68] sm:$0xff] (!%p241_p9)  ;;  %v1368_v21 = vld [vmem:[%s2108_s4 + $0x60] sm:$0xff] (!%p241_p9)  ;;  %v1381_v22 = vld [vmem:[%s2108_s4 + $0x78] sm:$0xff] (!%p241_p9)  ;;  %s1247_s21 = scalar_lea.sflag (!%p241_p9), [#allocation4], %s267_s14 }
  0x17   : > { %v1370_v23 = vld [vmem:[%s2108_s4 + $0x70] sm:$0xf] (!%p241_p9)  ;;  %v1383_v25 = vld [vmem:[%s2108_s4 + $0x88] sm:$0xf] (!%p241_p9)  ;;  %v1382_v26 = vld [vmem:[%s2108_s4 + $0x80] sm:$0xff] (!%p241_p9) }
  0x18   : > { %v1159_v28 = vld [vmem:[#allocation2] sm:$0x1]  ;;  %s270_s17 = scalar_select %p269_p10, %s1818_s6, 1  ;;  %v343_v59 = vld [vmem:[%s2107_s3 + $0x8] sm:$0xff]  ;;  %v344_v60 = vld [vmem:[%s2107_s3 + $0x10] sm:$0xf] }
  0x19   : > { %v342_v58 = vld [vmem:[%s2107_s3] sm:$0xff]  ;;  %s1753_s6 = smov [#allocation3]  }
  0x1a   : > { %315 = vperm.xlu1 %1600, %v302_v6   ;;  %288 = vperm.xlu0 %1599, %v275_v7   ;;  %s271_s20 = scalar_lea.vmem %s2104_s0, %s270_s17  ;;  %s1259_s17 = sshll.u32 %s268_s16, 4  ;;  %s2064_s17 = int_to_ptr.vmem [resolvable:$true] %s1259_s17 }
  0x1b   : > { %v1315_v29 = vld [vmem:[%s271_s20] ss:$0 sm:$0xff]  ;;  %s2062_s20 = scalar_lea.hbm %s2111_s7, %s1393_s15  ;;  %s1685_s22 = scalar_lea.vmem %s2064_s17, 16 }
  0x1c   : > { %p1686_p11 = scmp.ne.s32.totalorder %s2064_s17, %s1685_s22  ;;  %s1689_s23 = sshll.u32 %s1753_s6, 4  ;;  %s1690_s23 = int_to_ptr.vmem [resolvable:$false] %s1689_s23 }
  0x1d   : > { %s1691_s24 = scalar_lea.vmem %s1690_s23, 32  ;;  %p1692_p0 = scmp.lt.s32.totalorder %s2064_s17, %s1690_s23 }
  0x1e   : > { %355 = vperm.xlu1 %1600, %v346_v8   ;;  %350 = vperm.xlu0 %1599, %v345_v9   ;;  %p1687_p12 = pnand %p1686_p11, %p1835_p5  ;;  %p1693_p1 = scmp.lt.s32.totalorder %s1691_s24, %s1685_s22 }
  0x20   : > { %p1688_p13 = pneg %p1687_p12  ;;  %p1694_p2 = por %p1693_p1, %p1692_p0 }
  0x22   : > { %488 = vperm.xlu1 %1600, %v1329_v10   ;;  %360 = vperm.xlu0 %1599, %v347_v11   ;;  %p1695_p3 = pnand %p1694_p2, %p1688_p13 }
  0x26   : > { %498 = vperm.xlu1 %1600, %v1331_v12   ;;  %493 = vperm.xlu0 %1599, %v1330_v13  }
  0x2a   : > { %629 = vperm.xlu1 %1600, %v1343_v14   ;;  %624 = vperm.xlu0 %1599, %v1342_v15  }
  0x2e   : > { %760 = vperm.xlu1 %1600, %v1355_v16   ;;  %634 = vperm.xlu0 %1599, %v1344_v17  }
  0x32   : > { %770 = vperm.xlu1 %1600, %v1357_v18   ;;  %765 = vperm.xlu0 %1599, %v1356_v19  }
  0x36   : > { %901 = vperm.xlu1 %1600, %v1369_v20   ;;  %896 = vperm.xlu0 %1599, %v1368_v21  }
  0x3a   : > { %1032 = vperm.xlu1 %1600, %v1381_v22   ;;  %906 = vperm.xlu0 %1599, %v1370_v23  }
  0x3e   : > { %1042 = vperm.xlu1 %1600, %v1383_v25   ;;  %1037 = vperm.xlu0 %1599, %v1382_v26   ;;  %v1326_v26 = vld [vmem:[%s2107_s3 + $0x18] sm:$0xff] }
  0x42   : > { %1162 = vperm.xlu0 %1599, %v1159_v28   ;;  %v1327_v28 = vld [vmem:[%s2107_s3 + $0x20] sm:$0xff] }
  0x91   : > { %v306_v30 = vpop.permute.xlu1 %305  ;;  %v279_v31 = vpop.permute.xlu0 %278 }
  0x92   : > { %v297_v32 = vmul.f32 %v1315_v29, %v279_v31 }
  0x94   : > { %v318_v33 = vadd.f32 %v306_v30, %v297_v32 }
  0x95   : > { %v311_v34 = vpop.permute.xlu1 %310  ;;  %v284_v35 = vpop.permute.xlu0 %283 }
  0x96   : > { %v1316_v36 = vmul.f32 -1.442695, %v318_v33  ;;  %v298_v37 = vmul.f32 %v1315_v29, %v284_v35 }
  0x98   : > { %1601 = vpow2.f32 %v1316_v36  ;;  %v319_v38 = vadd.f32 %v311_v34, %v298_v37 }
  0x99   : > { %v289_v39 = vpop.permute.xlu0 %288  ;;  %v316_v42 = vpop.permute.xlu1 %315 }
  0x9a   : > { %v1317_v40 = vmul.f32 -1.442695, %v319_v38  ;;  %v299_v41 = vmul.f32 %v1315_v29, %v289_v39  ;;  %v1328_v29 = vld [vmem:[%s2107_s3 + $0x28] sm:$0xf] }
  0x9c   : > { %1603 = vpow2.f32 %v1317_v40  ;;  %v320_v43 = vadd.f32 %v316_v42, %v299_v41 }
  0x9d   : > { %v351_v61 = vpop.permute.xlu0 %350  ;;  %v356_v2 = vpop.permute.xlu1 %355 }
  0x9e   : > { %v1318_v44 = vmul.f32 -1.442695, %v320_v43 }
  0xa0   : > { %1605 = vpow2.f32 %v1318_v44 }
  0xa1   : > { %v361_v7 = vpop.permute.xlu0 %360  ;;  %v489_v30 = vpop.permute.xlu1 %488 }
  0xa2   : > { %v1602_v45 = vpop.eup %1601 }
  0xa3   : > { %v330_v46 = vadd.f32 1.0, %v1602_v45 }
  0xa5   : > { %1607 = vrcp.f32 %v330_v46  ;;  %v494_v35 = vpop.permute.xlu0 %493  ;;  %v499_v40 = vpop.permute.xlu1 %498 }
  0xa6   : > { %v1604_v47 = vpop.eup %1603 }
  0xa7   : > { %v331_v48 = vadd.f32 1.0, %v1604_v47 }
  0xa9   : > { %1609 = vrcp.f32 %v331_v48 }
  0xaa   : > { %v1606_v49 = vpop.eup %1605 }
  0xab   : > { %v332_v50 = vadd.f32 1.0, %v1606_v49 }
  0xad   : > { %1611 = vrcp.f32 %v332_v50 }
  0xaf   : > { %v1608_v51 = vpop.eup %1607 }
  0xb0   : > { %v339_v53 = vmul.f32 %v1608_v51, %v318_v33 }
  0xb3   : > { %v1610_v52 = vpop.eup %1609 }
  0xb4   : > { %v340_v54 = vmul.f32 %v1610_v52, %v319_v38 }
  0xb6   : > { %v1536_v55 = vpack.c.bf16 %v340_v54, %v339_v53 }
  0xb7   : > { %v1612_v56 = vpop.eup %1611 }
  0xb8   : > { %1537 = vmatpush3.bf16.msra.mxu0 %v1536_v55  ;;  %v341_v57 = vmul.f32 %v1612_v56, %v320_v43 }
  0xb9   : > { %1440 = vmatprep.subr.mxu0 %v1752_v27 }
  0xbc   : > { %1441 = vmatpush3.msk.msra.mxu0 %vm373_vm1, %v341_v57 }
  0xbd   : > { %1443 = vmatmul.mubr.msk.f32.vlgmr.msra.gmra.mrb[0].mxu0 %vm363_vm2, %v342_v58  ;;  %1541 = vmatprep.subr.bf16.mxu0 %v1750_v24  ;;  %v1339_v58 = vld [vmem:[%s2107_s3 + $0x30] sm:$0xff] }
  0xbe   : > { %1445 = vmatprep.mubr.msk.f32.mxu0 %vm1751_vm0, %v1752_v27 }
  0xc1   : > { %1446 = vmatmul.mubr.msk.f32.gmra.mrb[2].mxu0 %vm363_vm2, %v343_v59  ;;  %v1340_v59 = vld [vmem:[%s2107_s3 + $0x38] sm:$0xff] }
  0xc2   : > { %1448 = vmatprep.mubr.msk.f32.mxu0 %vm1751_vm0, %v1752_v27 }
  0xc5   : > { %1449 = vmatmul.mubr.msk.f32.gmra.mrb[4].mxu0 %vm363_vm2, %v344_v60  ;;  %v1341_v60 = vld [vmem:[%s2107_s3 + $0x40] sm:$0xf] }
  0xc6   : > { %1472 = vmatprep.mubr.msk.f32.mxu0 %vm1751_vm0, %v1752_v27 }
 0x190   : > { %v443_v62 = vpop.f32.mrb[0].mxu0 }
 0x191   : > { %v444_v63 = vadd.f32 %v443_v62, %v351_v61  ;;  %v1444_v0 = vpop.f32.mrb[1].mxu0  ;;  %v625_v61 = vpop.permute.xlu0 %624 }
 0x193   : > { %v1323_v1 = vmul.f32 -1.442695, %v444_v63 }
 0x194   : > { %v448_v3 = vpop.f32.mrb[2].mxu0 }
 0x195   : > { %1613 = vpow2.f32 %v1323_v1  ;;  %v449_v4 = vadd.f32 %v448_v3, %v356_v2  ;;  %v1447_v5 = vpop.f32.mrb[3].mxu0  ;;  %v630_v2 = vpop.permute.xlu1 %629 }
 0x197   : > { %v1324_v6 = vmul.f32 -1.442695, %v449_v4 }
 0x198   : > { %v453_v8 = vpop.f32.mrb[4].mxu0 }
 0x199   : > { %1615 = vpow2.f32 %v1324_v6  ;;  %v454_v9 = vadd.f32 %v453_v8, %v361_v7  ;;  %v1450_v10 = vpop.f32.mrb[5].mxu0  ;;  %v635_v7 = vpop.permute.xlu0 %634 }
 0x19b   : > { %v1325_v11 = vmul.f32 -1.442695, %v454_v9 }
 0x19d   : > { %1617 = vpow2.f32 %v1325_v11 }
 0x19f   : > { %v1614_v12 = vpop.eup %1613 }
 0x1a0   : > { %v466_v13 = vadd.f32 1.0, %v1614_v12 }
 0x1a2   : > { %1619 = vrcp.f32 %v466_v13 }
 0x1a3   : > { %v1616_v14 = vpop.eup %1615 }
 0x1a4   : > { %v467_v15 = vadd.f32 1.0, %v1616_v14 }
 0x1a6   : > { %1621 = vrcp.f32 %v467_v15 }
 0x1a7   : > { %v1618_v16 = vpop.eup %1617 }
 0x1a8   : > { %v468_v17 = vadd.f32 1.0, %v1618_v16 }
 0x1aa   : > { %1623 = vrcp.f32 %v468_v17 }
 0x1ac   : > { %v1620_v18 = vpop.eup %1619 }
 0x1ad   : > { %v475_v20 = vmul.f32 %v1620_v18, %v444_v63 }
 0x1b0   : > { %v1622_v19 = vpop.eup %1621 }
 0x1b1   : > { %v476_v21 = vmul.f32 %v1622_v19, %v449_v4 }
 0x1b3   : > { %v1539_v22 = vpack.c.bf16 %v476_v21, %v475_v20 }
 0x1b4   : > { %v1624_v23 = vpop.eup %1623 }
 0x1b5   : > { %1540 = vmatpush3.bf16.msra.mxu1 %v1539_v22  ;;  %v477_v25 = vmul.f32 %v1624_v23, %v454_v9 }
 0x1b6   : > { %1455 = vmatprep.subr.mxu1 %v1752_v27 }
 0x1b9   : > { %1456 = vmatpush3.msk.msra.mxu1 %vm373_vm1, %v477_v25 }
 0x1ba   : > { %1458 = vmatmul.mubr.msk.f32.vlgmr.msra.gmra.mrb[0].mxu1 %vm363_vm2, %v1326_v26  ;;  %1544 = vmatprep.subr.bf16.mxu1 %v1750_v24  ;;  %v1352_v26 = vld [vmem:[%s2107_s3 + $0x48] sm:$0xff] }
 0x1bb   : > { %1460 = vmatprep.mubr.msk.f32.mxu1 %vm1751_vm0, %v1752_v27 }
 0x1be   : > { %1461 = vmatmul.mubr.msk.f32.gmra.mrb[2].mxu1 %vm363_vm2, %v1327_v28  ;;  %v1353_v28 = vld [vmem:[%s2107_s3 + $0x50] sm:$0xff] }
 0x1bf   : > { %1463 = vmatprep.mubr.msk.f32.mxu1 %vm1751_vm0, %v1752_v27 }
 0x1c2   : > { %1464 = vmatmul.mubr.msk.f32.gmra.mrb[4].mxu1 %vm363_vm2, %v1328_v29  ;;  %v1354_v29 = vld [vmem:[%s2107_s3 + $0x58] sm:$0xf] }
 0x1c3   : > { %1487 = vmatprep.mubr.msk.f32.mxu1 %vm1751_vm0, %v1752_v27 }
 0x28d   : > { %v579_v31 = vpop.f32.mrb[0].mxu1 }
 0x28e   : > { %v580_v32 = vadd.f32 %v579_v31, %v489_v30  ;;  %v1459_v33 = vpop.f32.mrb[1].mxu1  ;;  %v761_v30 = vpop.permute.xlu1 %760 }
 0x290   : > { %v1336_v34 = vmul.f32 -1.442695, %v580_v32 }
 0x291   : > { %v584_v36 = vpop.f32.mrb[2].mxu1 }
 0x292   : > { %1625 = vpow2.f32 %v1336_v34  ;;  %v585_v37 = vadd.f32 %v584_v36, %v494_v35  ;;  %v1462_v38 = vpop.f32.mrb[3].mxu1  ;;  %v766_v35 = vpop.permute.xlu0 %765 }
 0x294   : > { %v1337_v39 = vmul.f32 -1.442695, %v585_v37 }
 0x295   : > { %v589_v41 = vpop.f32.mrb[4].mxu1 }
 0x296   : > { %1627 = vpow2.f32 %v1337_v39  ;;  %v590_v42 = vadd.f32 %v589_v41, %v499_v40  ;;  %v1465_v43 = vpop.f32.mrb[5].mxu1  ;;  %v771_v40 = vpop.permute.xlu1 %770 }
 0x298   : > { %v1338_v44 = vmul.f32 -1.442695, %v590_v42 }
 0x29a   : > { %1629 = vpow2.f32 %v1338_v44 }
 0x29c   : > { %v1626_v45 = vpop.eup %1625 }
 0x29d   : > { %v602_v46 = vadd.f32 1.0, %v1626_v45 }
 0x29f   : > { %1631 = vrcp.f32 %v602_v46 }
 0x2a0   : > { %v1628_v47 = vpop.eup %1627 }
 0x2a1   : > { %v603_v48 = vadd.f32 1.0, %v1628_v47 }
 0x2a3   : > { %1633 = vrcp.f32 %v603_v48 }
 0x2a4   : > { %v1630_v49 = vpop.eup %1629 }
 0x2a5   : > { %v604_v50 = vadd.f32 1.0, %v1630_v49 }
 0x2a7   : > { %1635 = vrcp.f32 %v604_v50 }
 0x2a9   : > { %v1632_v51 = vpop.eup %1631 }
 0x2aa   : > { %v611_v53 = vmul.f32 %v1632_v51, %v580_v32 }
 0x2ad   : > { %v1634_v52 = vpop.eup %1633 }
 0x2ae   : > { %v612_v54 = vmul.f32 %v1634_v52, %v585_v37 }
 0x2b0   : > { %v1542_v55 = vpack.c.bf16 %v612_v54, %v611_v53 }
 0x2b1   : > { %v1636_v56 = vpop.eup %1635 }
 0x2b2   : > { %1543 = vmatpush3.bf16.msra.mxu0 %v1542_v55  ;;  %v613_v57 = vmul.f32 %v1636_v56, %v590_v42 }
 0x2b3   : > { %1470 = vmatprep.subr.mxu0 %v1752_v27 }
 0x2b6   : > { %1471 = vmatpush3.msk.msra.mxu0 %vm373_vm1, %v613_v57 }
 0x2b7   : > { %1473 = vmatmul.mubr.msk.f32.vlgmr.msra.gmra.mrb[6].mxu0 %vm363_vm2, %v1339_v58  ;;  %1547 = vmatprep.subr.bf16.mxu0 %v1750_v24  ;;  %v1365_v58 = vld [vmem:[%s2107_s3 + $0x60] sm:$0xff] }
 0x2b8   : > { %1475 = vmatprep.mubr.msk.f32.mxu0 %vm1751_vm0, %v1752_v27 }
 0x2bb   : > { %1476 = vmatmul.mubr.msk.f32.gmra.mrb[8].mxu0 %vm363_vm2, %v1340_v59  ;;  %v1366_v59 = vld [vmem:[%s2107_s3 + $0x68] sm:$0xff] }
 0x2bc   : > { %1478 = vmatprep.mubr.msk.f32.mxu0 %vm1751_vm0, %v1752_v27 }
 0x2bf   : > { %1479 = vmatmul.mubr.msk.f32.gmra.mrb[10].mxu0 %vm363_vm2, %v1341_v60  ;;  %v1367_v60 = vld [vmem:[%s2107_s3 + $0x70] sm:$0xf] }
 0x2c0   : > { %1502 = vmatprep.mubr.msk.f32.mxu0 %vm1751_vm0, %v1752_v27 }
 0x38a   : > { %v715_v62 = vpop.f32.mrb[6].mxu0 }
 0x38b   : > { %v716_v63 = vadd.f32 %v715_v62, %v625_v61  ;;  %v1474_v0 = vpop.f32.mrb[7].mxu0 }
 0x38d   : > { %v1349_v1 = vmul.f32 -1.442695, %v716_v63 }
 0x38e   : > { %v720_v3 = vpop.f32.mrb[8].mxu0 }
 0x38f   : > { %1637 = vpow2.f32 %v1349_v1  ;;  %v721_v4 = vadd.f32 %v720_v3, %v630_v2  ;;  %v1477_v5 = vpop.f32.mrb[9].mxu0  ;;  %v902_v1 = vpop.permute.xlu1 %901 }
 0x391   : > { %v1350_v6 = vmul.f32 -1.442695, %v721_v4 }
 0x392   : > { %v725_v8 = vpop.f32.mrb[10].mxu0 }
 0x393   : > { %1639 = vpow2.f32 %v1350_v6  ;;  %v726_v9 = vadd.f32 %v725_v8, %v635_v7  ;;  %v1480_v10 = vpop.f32.mrb[11].mxu0 }
 0x395   : > { %v1351_v11 = vmul.f32 -1.442695, %v726_v9 }
 0x397   : > { %1641 = vpow2.f32 %v1351_v11 }
 0x399   : > { %v1638_v12 = vpop.eup %1637 }
 0x39a   : > { %v738_v13 = vadd.f32 1.0, %v1638_v12 }
 0x39c   : > { %1643 = vrcp.f32 %v738_v13 }
 0x39d   : > { %v1640_v14 = vpop.eup %1639 }
 0x39e   : > { %v739_v15 = vadd.f32 1.0, %v1640_v14 }
 0x3a0   : > { %1645 = vrcp.f32 %v739_v15 }
 0x3a1   : > { %v1642_v16 = vpop.eup %1641 }
 0x3a2   : > { %v740_v17 = vadd.f32 1.0, %v1642_v16 }
 0x3a4   : > { %1647 = vrcp.f32 %v740_v17 }
 0x3a6   : > { %v1644_v18 = vpop.eup %1643 }
 0x3a7   : > { %v747_v20 = vmul.f32 %v1644_v18, %v716_v63 }
 0x3aa   : > { %v1646_v19 = vpop.eup %1645 }
 0x3ab   : > { %v748_v21 = vmul.f32 %v1646_v19, %v721_v4 }
 0x3ad   : > { %v1545_v22 = vpack.c.bf16 %v748_v21, %v747_v20 }
 0x3ae   : > { %v1648_v23 = vpop.eup %1647 }
 0x3af   : > { %1546 = vmatpush3.bf16.msra.mxu1 %v1545_v22  ;;  %v749_v25 = vmul.f32 %v1648_v23, %v726_v9 }
 0x3b0   : > { %1485 = vmatprep.subr.mxu1 %v1752_v27 }
 0x3b3   : > { %1486 = vmatpush3.msk.msra.mxu1 %vm373_vm1, %v749_v25  ;;  %v1378_v25 = vld [vmem:[%s2107_s3 + $0x78] sm:$0xff] }
 0x3b4   : > { %1488 = vmatmul.mubr.msk.f32.vlgmr.msra.gmra.mrb[6].mxu1 %vm363_vm2, %v1352_v26  ;;  %1550 = vmatprep.subr.bf16.mxu1 %v1750_v24  ;;  %v1379_v26 = vld [vmem:[%s2107_s3 + $0x80] sm:$0xff] }
 0x3b5   : > { %1490 = vmatprep.mubr.msk.f32.mxu1 %vm1751_vm0, %v1752_v27 }
 0x3b8   : > { %1491 = vmatmul.mubr.msk.f32.gmra.mrb[8].mxu1 %vm363_vm2, %v1353_v28  ;;  %v1380_v28 = vld [vmem:[%s2107_s3 + $0x88] sm:$0xf] }
 0x3b9   : > { %1493 = vmatprep.mubr.msk.f32.mxu1 %vm1751_vm0, %v1752_v27 }
 0x3bc   : > { %1494 = vmatmul.mubr.msk.f32.gmra.mrb[10].mxu1 %vm363_vm2, %v1354_v29  ;;  %v1033_v29 = vpop.permute.xlu1 %1032 }
 0x3bd   : > { %1517 = vmatprep.mubr.msk.f32.mxu1 %vm1751_vm0, %v1752_v27 }
 0x487   : > { %v851_v31 = vpop.f32.mrb[6].mxu1 }
 0x488   : > { %v852_v32 = vadd.f32 %v851_v31, %v761_v30  ;;  %v1489_v33 = vpop.f32.mrb[7].mxu1 }
 0x48a   : > { %v1362_v34 = vmul.f32 -1.442695, %v852_v32 }
 0x48b   : > { %v856_v36 = vpop.f32.mrb[8].mxu1 }
 0x48c   : > { %1649 = vpow2.f32 %v1362_v34  ;;  %v857_v37 = vadd.f32 %v856_v36, %v766_v35  ;;  %v1492_v38 = vpop.f32.mrb[9].mxu1 }
 0x48e   : > { %v1363_v39 = vmul.f32 -1.442695, %v857_v37 }
 0x48f   : > { %v861_v41 = vpop.f32.mrb[10].mxu1 }
 0x490   : > { %1651 = vpow2.f32 %v1363_v39  ;;  %v862_v42 = vadd.f32 %v861_v41, %v771_v40  ;;  %v1495_v43 = vpop.f32.mrb[11].mxu1  ;;  %v1043_v39 = vpop.permute.xlu1 %1042 }
 0x492   : > { %v1364_v44 = vmul.f32 -1.442695, %v862_v42 }
 0x494   : > { %1653 = vpow2.f32 %v1364_v44 }
 0x496   : > { %v1650_v45 = vpop.eup %1649 }
 0x497   : > { %v874_v46 = vadd.f32 1.0, %v1650_v45 }
 0x499   : > { %1655 = vrcp.f32 %v874_v46 }
 0x49a   : > { %v1652_v47 = vpop.eup %1651 }
 0x49b   : > { %v875_v48 = vadd.f32 1.0, %v1652_v47 }
 0x49d   : > { %1657 = vrcp.f32 %v875_v48 }
 0x49e   : > { %v1654_v49 = vpop.eup %1653 }
 0x49f   : > { %v876_v50 = vadd.f32 1.0, %v1654_v49 }
 0x4a1   : > { %1659 = vrcp.f32 %v876_v50 }
 0x4a3   : > { %v1656_v51 = vpop.eup %1655 }
 0x4a4   : > { %v883_v53 = vmul.f32 %v1656_v51, %v852_v32 }
 0x4a7   : > { %v1658_v52 = vpop.eup %1657 }
 0x4a8   : > { %v884_v54 = vmul.f32 %v1658_v52, %v857_v37 }
 0x4aa   : > { %v1548_v55 = vpack.c.bf16 %v884_v54, %v883_v53 }
 0x4ab   : > { %v1660_v56 = vpop.eup %1659 }
 0x4ac   : > { %1549 = vmatpush3.bf16.msra.mxu0 %v1548_v55  ;;  %v885_v57 = vmul.f32 %v1660_v56, %v862_v42 }
 0x4ad   : > { %1500 = vmatprep.subr.mxu0 %v1752_v27 }
 0x4b0   : > { %1501 = vmatpush3.msk.msra.mxu0 %vm373_vm1, %v885_v57  ;;  %v1158_v57 = vld [vmem:[%s2109_s5] sm:$0x1] }
 0x4b1   : > { %1503 = vmatmul.mubr.msk.f32.vlgmr.msra.gmra.mrb[12].mxu0 %vm363_vm2, %v1365_v58  ;;  %1553 = vmatprep.subr.bf16.mxu0 %v1750_v24  ;;  %v897_v24 = vpop.permute.xlu0 %896  ;;  %v1165_v58 = vlaneseq }
 0x4b2   : > { %1505 = vmatprep.mubr.msk.f32.mxu0 %vm1751_vm0, %v1752_v27 }
 0x4b5   : > { %1506 = vmatmul.mubr.msk.f32.gmra.mrb[14].mxu0 %vm363_vm2, %v1366_v59  ;;  %v907_v6 = vpop.permute.xlu0 %906  ;;  %v1166_v59 = vshrl.u32 %v1165_v58, 7 }
 0x4b6   : > { %1508 = vmatprep.mubr.msk.f32.mxu0 %vm1751_vm0, %v1752_v27 }
 0x4b9   : > { %1509 = vmatmul.mubr.msk.f32.gmra.mrb[16].mxu0 %vm363_vm2, %v1367_v60  ;;  %v1038_v34 = vpop.permute.xlu0 %1037  ;;  %v1167_v60 = vsub.s32 0, %v1166_v59 }
 0x4ba   : > { %1532 = vmatprep.mubr.msk.f32.mxu0 %vm1751_vm0, %v1752_v27 }
 0x584   : > { %v987_v61 = vpop.f32.mrb[12].mxu0 }
 0x585   : > { %v988_v62 = vadd.f32 %v987_v61, %v897_v24  ;;  %v1504_v63 = vpop.f32.mrb[13].mxu0  ;;  %v1163_v24 = vpop.permute.xlu0 %1162 }
 0x586   : > { %v1168_v61 = vrot.slane %v1163_v24, %v1167_v60 }
 0x587   : > { %v1375_v0 = vmul.f32 -1.442695, %v988_v62 }
 0x588   : > { %v992_v2 = vpop.f32.mrb[14].mxu0 }
 0x589   : > { %1661 = vpow2.f32 %v1375_v0  ;;  %v993_v3 = vadd.f32 %v992_v2, %v902_v1  ;;  %v1507_v4 = vpop.f32.mrb[15].mxu0 }
 0x58b   : > { %v1376_v5 = vmul.f32 -1.442695, %v993_v3 }
 0x58c   : > { %v997_v7 = vpop.f32.mrb[16].mxu0 }
 0x58d   : > { %1663 = vpow2.f32 %v1376_v5  ;;  %v998_v8 = vadd.f32 %v997_v7, %v907_v6  ;;  %v1510_v9 = vpop.f32.mrb[17].mxu0 }
 0x58f   : > { %v1377_v10 = vmul.f32 -1.442695, %v998_v8 }
 0x591   : > { %1665 = vpow2.f32 %v1377_v10 }
 0x593   : > { %v1662_v11 = vpop.eup %1661 }
 0x594   : > { %v1010_v12 = vadd.f32 1.0, %v1662_v11 }
 0x596   : > { %1667 = vrcp.f32 %v1010_v12 }
 0x597   : > { %v1664_v13 = vpop.eup %1663 }
 0x598   : > { %v1011_v14 = vadd.f32 1.0, %v1664_v13 }
 0x59a   : > { %1669 = vrcp.f32 %v1011_v14 }
 0x59b   : > { %v1666_v15 = vpop.eup %1665 }
 0x59c   : > { %v1012_v16 = vadd.f32 1.0, %v1666_v15 }
 0x59e   : > { %1671 = vrcp.f32 %v1012_v16 }
 0x5a0   : > { %v1668_v17 = vpop.eup %1667 }
 0x5a1   : > { %v1019_v19 = vmul.f32 %v1668_v17, %v988_v62 }
 0x5a4   : > { %v1670_v18 = vpop.eup %1669 }
 0x5a5   : > { %v1020_v20 = vmul.f32 %v1670_v18, %v993_v3 }
 0x5a7   : > { %v1551_v21 = vpack.c.bf16 %v1020_v20, %v1019_v19 }
 0x5a8   : > { %v1672_v22 = vpop.eup %1671 }
 0x5a9   : > { %1552 = vmatpush3.bf16.msra.mxu1 %v1551_v21  ;;  %v1021_v23 = vmul.f32 %v1672_v22, %v998_v8 }
 0x5aa   : > { %1515 = vmatprep.subr.mxu1 %v1752_v27 }
 0x5ad   : > { %1516 = vmatpush3.msk.msra.mxu1 %vm373_vm1, %v1021_v23 }
 0x5ae   : > { %1518 = vmatmul.mubr.msk.f32.vlgmr.msra.gmra.mrb[12].mxu1 %vm363_vm2, %v1378_v25 }
 0x5af   : > { %1520 = vmatprep.mubr.msk.f32.mxu1 %vm1751_vm0, %v1752_v27 }
 0x5b2   : > { %1521 = vmatmul.mubr.msk.f32.gmra.mrb[14].mxu1 %vm363_vm2, %v1379_v26 }
 0x5b3   : > { %1523 = vmatprep.mubr.msk.f32.mxu1 %vm1751_vm0, %v1752_v27 }
 0x5b6   : > { %1524 = vmatmul.mubr.msk.f32.gmra.mrb[16].mxu1 %vm363_vm2, %v1380_v28 }
 0x681   : > { %v1123_v30 = vpop.f32.mrb[12].mxu1 }
 0x682   : > { %v1124_v31 = vadd.f32 %v1123_v30, %v1033_v29  ;;  %v1519_v32 = vpop.f32.mrb[13].mxu1 }
 0x684   : > { %v1388_v33 = vmul.f32 -1.442695, %v1124_v31 }
 0x685   : > { %v1128_v35 = vpop.f32.mrb[14].mxu1 }
 0x686   : > { %1673 = vpow2.f32 %v1388_v33  ;;  %v1129_v36 = vadd.f32 %v1128_v35, %v1038_v34  ;;  %v1522_v37 = vpop.f32.mrb[15].mxu1 }
 0x688   : > { %v1389_v38 = vmul.f32 -1.442695, %v1129_v36 }
 0x689   : > { %v1133_v40 = vpop.f32.mrb[16].mxu1 }
 0x68a   : > { %1675 = vpow2.f32 %v1389_v38  ;;  %v1134_v41 = vadd.f32 %v1133_v40, %v1043_v39  ;;  %v1525_v42 = vpop.f32.mrb[17].mxu1 }
 0x68c   : > { %v1390_v43 = vmul.f32 -1.442695, %v1134_v41 }
 0x68e   : > { %1677 = vpow2.f32 %v1390_v43 }
 0x690   : > { %v1674_v44 = vpop.eup %1673 }
 0x691   : > { %v1146_v45 = vadd.f32 1.0, %v1674_v44 }
 0x693   : > { %1679 = vrcp.f32 %v1146_v45 }
 0x694   : > { %v1676_v46 = vpop.eup %1675 }
 0x695   : > { %v1147_v47 = vadd.f32 1.0, %v1676_v46 }
 0x697   : > { %1681 = vrcp.f32 %v1147_v47 }
 0x698   : > { %v1678_v48 = vpop.eup %1677 }
 0x699   : > { %v1148_v49 = vadd.f32 1.0, %v1678_v48 }
 0x69b   : > { %1683 = vrcp.f32 %v1148_v49 }
 0x69d   : > { %v1680_v50 = vpop.eup %1679 }
 0x69e   : > { %v1155_v52 = vmul.f32 %v1680_v50, %v1124_v31 }
 0x6a1   : > { %v1682_v51 = vpop.eup %1681 }
 0x6a2   : > { %v1156_v53 = vmul.f32 %v1682_v51, %v1129_v36 }
 0x6a4   : > { %v1554_v54 = vpack.c.bf16 %v1156_v53, %v1155_v52 }
 0x6a5   : > { %v1684_v55 = vpop.eup %1683 }
 0x6a6   : > { %1555 = vmatpush3.bf16.msra.mxu0 %v1554_v54  ;;  %v1157_v56 = vmul.f32 %v1684_v55, %v1134_v41 }
 0x6a7   : > { %1530 = vmatprep.subr.mxu0 %v1752_v27 }
 0x6aa   : > { %1531 = vmatpush3.msk.msra.mxu0 %vm373_vm1, %v1157_v56 }
 0x6ab   : > { %1533 = vmatmul.mubr.msk.f32.vlgmr.msra.gmra.mrb[18].mxu0 %vm363_vm2, %v1158_v57 }
 0x77e   : > { %v1241_v27 = vpop.f32.mrb[18].mxu0 }
 0x77f   : > { %v1242_v62 = vadd.f32 %v1241_v27, %v1168_v61  ;;  %v1534_v63 = vpop.f32.mrb[19].mxu0 }
 0x781   : > { %1245 = vst [vmem:[%s268_s16] sm:$0x1] %v1242_v62 }
 0x782   : > { %1698 = shalt.err (!%p1695_p3)
}
 0x783   : > { %s1699_s25 = scalar_lea.hbm %s2062_s20, 16  ;;  %s1703_s10 = scalar_lea.hbm %s2111_s7, 32 }
 0x784   : > { %p1700_p4 = scmp.ne.s32.totalorder %s2062_s20, %s1699_s25  ;;  %p1704_p9 = scmp.lt.u32.totalorder %s2062_s20, %s2111_s7 }
 0x785   : > { %p1705_p10 = scmp.lt.u32.totalorder %s1703_s10, %s1699_s25  ;;  %p1707_p12 = scmp.lt.u32.totalorder %s1699_s25, %s2062_s20 }
 0x786   : > { %p1701_p7 = pnand %p1700_p4, %p1835_p5 }
 0x787   : > { %p1706_p11 = por %p1705_p10, %p1704_p9 }
 0x788   : > { %p1702_p8 = pneg %p1701_p7 }
 0x789   : > { %p1708_p13 = por %p1707_p12, %p1706_p11 }
 0x78b   : > { %p1709_p0 = pnand %p1708_p13, %p1702_p8 }
 0x78d   : > { %1712 = shalt.err (!%p1709_p0)
}
 0x78e   : > { %1556 = dma.vmem_to_hbm [thread:$0]  (%p1835_p5), %s2064_s17, 16, %s2062_s20, %s1247_s21  }
 0x78f PF: > { %p1562_p1 = scmp.ge.s32.totalorder %s1747_s29, 2  ;;  %s1271_s16 = sand.u32 1, %s1735_s26  }
 0x790   : > { %s1272_s18 = scalar_lea.sflag [#allocation4], %s1271_s16 }
 0x791   : > { %p1559_p2 = pnand %p1562_p1, %p1839_p6 }
 0x793   : > { %1730 = dma.done.wait (!%p1559_p2), %s1272_s18, 16  }
 0x794   : > { %1732 = vsyncadd (!%p1559_p2), %s1272_s18, 4294967280  ;;  %p19_p3 = scmp.ge.s32.totalorder %s1822_s8, 4   ;;  %s2114_s26 = smov %s1739_s27 }
 0x795   : > { %s2115_s27 = smov %s1743_s28  ;;  %s2116_s28 = smov %s1833_s11 }
 0x796   : > { %s2117_s29 = smov %s1822_s8  ;;  %21 = sbr.rel (!%p19_p3) target bundleno = 6 (0x6), region = 93 }
 0x79d   :  { %1276 = vsyncpa [#allocation4], 1 }
 0x79e   :  { %1278 = vsyncpa [#allocation4 + $0x1], 1 }

</bundles_post_ra>
